<compile_context>
chip_gen: v5e
topology: v5e:2x2
jax: 0.10.0
libtpu: 0.0.40
codegen_flags: <defaults>
</compile_context>

<pallas_src>
import jax
import jax.numpy as jnp
from jax.experimental import pallas as pl
from jax.experimental.pallas import tpu as pltpu


def _round_up(x, m):
    return ((x + m - 1) // m) * m


def _pad_axis(a, axis, target):
    pad = target - a.shape[axis]
    if pad == 0:
        return a
    widths = [(0, 0)] * a.ndim
    widths[axis] = (0, pad)
    return jnp.pad(a, widths)


def classblock_kernel(x_ref, w1_ref, b1_ref, w2_ref, b2_ref, out_ref):
    # x:  (Bp, Dp) bf16        w1: (Dp, Hp) bf16 (BatchNorm folded in)
    # b1: (1, Hp)  f32         w2: (Hp, tn) bf16 tile of classifier weight
    # b2: (1, tn)  f32         out:(Bp, tn) f32
    #
    # Bottleneck Linear (+ folded BN) — f32 accumulation on the MXU.
    # x/w1/b1 block indices are constant across the grid, so they stay resident;
    # the tiny (Bp x Hp) recompute per class-tile is hidden under the w2 DMA and
    # keeps the kernel correct under "parallel" (megacore-sharded) semantics.
    h = jnp.dot(x_ref[...], w1_ref[...], preferred_element_type=jnp.float32)
    h = h + b1_ref[...]
    # relu=False -> no LeakyReLU; Dropout is identity in eval mode.

    # Classifier Linear on this class-tile.
    out = jnp.dot(h.astype(w2_ref.dtype), w2_ref[...],
                  preferred_element_type=jnp.float32) + b2_ref[...]
    out_ref[...] = out.astype(out_ref.dtype)


def classblock_forward(x, params, *, tn=256):
    """x: (B, input_dim) f32/bf16. params: folded kernel params (see fold_classblock_params)."""
    B, D = x.shape
    w1, b1, w2, b2 = params["w1"], params["b1"], params["w2"], params["b2"]
    H = w1.shape[1]
    C = w2.shape[1]

    # Pad to hardware-friendly shapes: sublane multiple of 8, lanes multiple of 128.
    Bp = _round_up(B, 8)
    Dp = _round_up(D, 128)
    Hp = _round_up(H, 128)
    tn = min(tn, _round_up(C, 128))
    Cp = _round_up(C, tn)
    n_steps = Cp // tn

    xp = _pad_axis(_pad_axis(x.astype(jnp.bfloat16), 0, Bp), 1, Dp)
    w1p = _pad_axis(_pad_axis(w1, 0, Dp), 1, Hp)
    b1p = _pad_axis(b1, 1, Hp)
    w2p = _pad_axis(_pad_axis(w2, 0, Hp), 1, Cp)
    b2p = _pad_axis(b2, 1, Cp)

    # VMEM footprint: resident x/w1/b1 + double-buffered w2/b2/out tiles.
    footprint = (
        Bp * Dp * 2 + Dp * Hp * 2 + Hp * 4            # resident operands
        + 2 * (Hp * tn * 2) + 2 * (tn * 4)            # double-buffered w2/b2 tiles
        + 2 * (Bp * tn * 4)                           # double-buffered out tiles
    )
    vmem_bytes = int(max(footprint + (4 << 20), 32 << 20))

    cost = pl.CostEstimate(
        flops=int(2 * Bp * Dp * Hp * n_steps + 2 * Bp * Hp * Cp),
        transcendentals=0,
        bytes_accessed=int(xp.size * 2 + w1p.size * 2 + b1p.size * 4
                           + w2p.size * 2 + b2p.size * 4 + Bp * Cp * 4),
    )

    out = pl.pallas_call(
        classblock_kernel,
        out_shape=jax.ShapeDtypeStruct((Bp, Cp), jnp.float32),
        grid=(n_steps,),
        in_specs=[
            pl.BlockSpec((Bp, Dp), lambda j: (0, 0)),   # x   (resident)
            pl.BlockSpec((Dp, Hp), lambda j: (0, 0)),   # w1  (resident, BN folded)
            pl.BlockSpec((1, Hp), lambda j: (0, 0)),    # b1  (resident)
            pl.BlockSpec((Hp, tn), lambda j: (0, j)),   # w2  class-tile (pipelined)
            pl.BlockSpec((1, tn), lambda j: (0, j)),    # b2  class-tile
        ],
        out_specs=pl.BlockSpec((Bp, tn), lambda j: (0, j)),
        compiler_params=pltpu.CompilerParams(
            dimension_semantics=("parallel",),
            vmem_limit_bytes=vmem_bytes,
        ),
        cost_estimate=cost,
    )(xp, w1p, b1p, w2p, b2p)

    return out[:B, :C]


def init_classblock_params(key, input_dim, num_bottleneck, class_num):
    """Raw PyTorch-style params (weights_init_kaiming / weights_init_classifier)."""
    k1, k2, k3 = jax.random.split(key, 3)

    # Linear(input_dim, num_bottleneck): kaiming_normal_(a=0, mode='fan_out')
    # PyTorch weight is (out, in); fan_out = out_features; std = sqrt(2/fan_out).
    std1 = (2.0 / num_bottleneck) ** 0.5
    w1 = jax.random.normal(k1, (input_dim, num_bottleneck), jnp.float32) * std1
    b1 = jnp.zeros((num_bottleneck,), jnp.float32)

    # BatchNorm1d: weight ~ N(1, 0.02), bias = 0, running_mean = 0, running_var = 1.
    gamma = 1.0 + 0.02 * jax.random.normal(k2, (num_bottleneck,), jnp.float32)
    beta = jnp.zeros((num_bottleneck,), jnp.float32)
    running_mean = jnp.zeros((num_bottleneck,), jnp.float32)
    running_var = jnp.ones((num_bottleneck,), jnp.float32)

    # classifier Linear: weight ~ N(0, 0.001), bias = 0.
    w2 = 0.001 * jax.random.normal(k3, (num_bottleneck, class_num), jnp.float32)
    b2 = jnp.zeros((class_num,), jnp.float32)

    return dict(w1=w1, b1=b1, gamma=gamma, beta=beta,
                running_mean=running_mean, running_var=running_var,
                eps=1e-5, w2=w2, b2=b2)


def fold_classblock_params(raw):
    """Fold eval-mode BatchNorm into the first Linear; cast weights to bf16."""
    scale = raw["gamma"] / jnp.sqrt(raw["running_var"] + raw["eps"])
    w1f = (raw["w1"] * scale[None, :]).astype(jnp.bfloat16)
    b1f = ((raw["b1"] - raw["running_mean"]) * scale + raw["beta"]).astype(jnp.float32)
    return dict(
        w1=w1f,
        b1=b1f.reshape(1, -1),
        w2=raw["w2"].astype(jnp.bfloat16),
        b2=raw["b2"].astype(jnp.float32).reshape(1, -1),
    )


def classblock_ref(x, raw):
    """Pure-JAX f32 reference (eval-mode ClassBlock forward, return_f=False)."""
    h = x @ raw["w1"] + raw["b1"][None, :]
    scale = raw["gamma"] / jnp.sqrt(raw["running_var"] + raw["eps"])
    h = (h - raw["running_mean"][None, :]) * scale[None, :] + raw["beta"][None, :]
    # relu=False -> no LeakyReLU; Dropout identity in eval mode.
    return h @ raw["w2"] + raw["b2"][None, :]


# TODO(synk): training-mode BatchNorm (batch statistics) and stochastic Dropout
#             are not implemented; eval-mode semantics are used.
# TODO(synk): return_f=True path (returning [logits, features, feature_map]) not
#             implemented; default return_f=False is what the kernel computes.


if __name__ == "__main__":
    # Small, lane-aligned shapes consistent with ClassBlock's (batch, input_dim) input.
    B, INPUT_DIM, NUM_BOTTLENECK, CLASS_NUM = 8, 256, 128, 512

    key = jax.random.PRNGKey(0)
    kx, kp = jax.random.split(key)
    x = jax.random.normal(kx, (B, INPUT_DIM), jnp.float32)

    raw = init_classblock_params(kp, INPUT_DIM, NUM_BOTTLENECK, CLASS_NUM)
    params = fold_classblock_params(raw)

    out = classblock_forward(x, params, tn=256)
    out = jax.block_until_ready(out)

    ref = classblock_ref(x, raw)
    assert out.shape == (B, CLASS_NUM)
    # bf16 matmuls with f32 accumulation -> loosened tolerance vs f32 reference.
    assert jnp.allclose(out, ref, atol=2e-3, rtol=5e-2), "mismatch vs JAX reference"

    print("KERNEL_OK")
</pallas_src>

<mosaic_0001>
module attributes {stable_mosaic.version = 11 : i64} {
  func.func @classblock_kernel(%arg0: i32, %arg1: memref<8x256xbf16, #tpu.memory_space<vmem>>, %arg2: memref<256x128xbf16, #tpu.memory_space<vmem>>, %arg3: memref<1x128xf32, #tpu.memory_space<vmem>>, %arg4: memref<128x256xbf16, #tpu.memory_space<vmem>>, %arg5: memref<1x256xf32, #tpu.memory_space<vmem>>, %arg6: memref<8x256xf32, #tpu.memory_space<vmem>>) attributes {dimension_semantics = [#tpu.dimension_semantics<parallel>], iteration_bounds = array<i64: 2>, scalar_prefetch = 0 : i64, scratch_operands = 0 : i64, tpu.core_type = #tpu.core_type<tc>, window_params = [{pipeline_mode = #tpu.pipeline_mode<synchronous>, transform_indices = @transform_0, window_bounds = array<i64: 8, 256>}, {pipeline_mode = #tpu.pipeline_mode<synchronous>, transform_indices = @transform_1, window_bounds = array<i64: 256, 128>}, {pipeline_mode = #tpu.pipeline_mode<synchronous>, transform_indices = @transform_2, window_bounds = array<i64: 1, 128>}, {transform_indices = @transform_3, window_bounds = array<i64: 128, 256>}, {transform_indices = @transform_4, window_bounds = array<i64: 1, 256>}, {transform_indices = @transform_5, window_bounds = array<i64: 8, 256>}]} {
    %c0 = arith.constant 0 : index
    %c0_0 = arith.constant 0 : index
    %0 = vector.load %arg1[%c0, %c0_0] : memref<8x256xbf16, #tpu.memory_space<vmem>>, vector<8x256xbf16>
    %c0_1 = arith.constant 0 : index
    %c0_2 = arith.constant 0 : index
    %1 = vector.load %arg2[%c0_1, %c0_2] : memref<256x128xbf16, #tpu.memory_space<vmem>>, vector<256x128xbf16>
    %cst = arith.constant dense<0.000000e+00> : vector<8x128xf32>
    %2 = tpu.matmul %0, %1, %cst {dimension_numbers = #tpu.dot_dimension_numbers<[1], [0], [0], [1], [0, 0, 1, 1], [], []>} : vector<8x256xbf16>, vector<256x128xbf16>, vector<8x128xf32> -> vector<8x128xf32>
    %c0_3 = arith.constant 0 : index
    %c0_4 = arith.constant 0 : index
    %3 = vector.load %arg3[%c0_3, %c0_4] : memref<1x128xf32, #tpu.memory_space<vmem>>, vector<1x128xf32>
    %4 = vector.broadcast %3 : vector<1x128xf32> to vector<8x128xf32>
    %5 = arith.addf %2, %4 : vector<8x128xf32>
    %6 = arith.truncf %5 : vector<8x128xf32> to vector<8x128xbf16>
    %c0_5 = arith.constant 0 : index
    %c0_6 = arith.constant 0 : index
    %7 = vector.load %arg4[%c0_5, %c0_6] : memref<128x256xbf16, #tpu.memory_space<vmem>>, vector<128x256xbf16>
    %cst_7 = arith.constant dense<0.000000e+00> : vector<8x256xf32>
    %8 = tpu.matmul %6, %7, %cst_7 {dimension_numbers = #tpu.dot_dimension_numbers<[1], [0], [0], [1], [0, 0, 1, 1], [], []>} : vector<8x128xbf16>, vector<128x256xbf16>, vector<8x256xf32> -> vector<8x256xf32>
    %c0_8 = arith.constant 0 : index
    %c0_9 = arith.constant 0 : index
    %9 = vector.load %arg5[%c0_8, %c0_9] : memref<1x256xf32, #tpu.memory_space<vmem>>, vector<1x256xf32>
    %10 = vector.broadcast %9 : vector<1x256xf32> to vector<8x256xf32>
    %11 = arith.addf %8, %10 : vector<8x256xf32>
    %c0_10 = arith.constant 0 : index
    %c0_11 = arith.constant 0 : index
    %12 = vector.load %arg6[%c0_10, %c0_11] : memref<8x256xf32, #tpu.memory_space<vmem>>, vector<8x256xf32>
    tpu.vector_store %arg6[%c0_10, %c0_11], %11 {strides = array<i32>} : memref<8x256xf32, #tpu.memory_space<vmem>>, vector<8x256xf32>,
    return
  }
  func.func @transform_0(%arg0: i32) -> (i32, i32) {
    %c0_i32 = arith.constant 0 : i32
    %c0_i32_0 = arith.constant 0 : i32
    %c0_i32_1 = arith.constant 0 : i32
    return %c0_i32, %c0_i32_0 : i32, i32
  }
  func.func @transform_1(%arg0: i32) -> (i32, i32) {
    %c0_i32 = arith.constant 0 : i32
    %c0_i32_0 = arith.constant 0 : i32
    %c0_i32_1 = arith.constant 0 : i32
    return %c0_i32, %c0_i32_0 : i32, i32
  }
  func.func @transform_2(%arg0: i32) -> (i32, i32) {
    %c0_i32 = arith.constant 0 : i32
    %c0_i32_0 = arith.constant 0 : i32
    %c0_i32_1 = arith.constant 0 : i32
    return %c0_i32, %c0_i32_0 : i32, i32
  }
  func.func @transform_3(%arg0: i32) -> (i32, i32) {
    %c0_i32 = arith.constant 0 : i32
    %c0_i32_0 = arith.constant 0 : i32
    return %c0_i32, %arg0 : i32, i32
  }
  func.func @transform_4(%arg0: i32) -> (i32, i32) {
    %c0_i32 = arith.constant 0 : i32
    %c0_i32_0 = arith.constant 0 : i32
    return %c0_i32, %arg0 : i32, i32
  }
  func.func @transform_5(%arg0: i32) -> (i32, i32) {
    %c0_i32 = arith.constant 0 : i32
    %c0_i32_0 = arith.constant 0 : i32
    return %c0_i32, %arg0 : i32, i32
  }
}

</mosaic_0001>

<bundles_post_ra>
// kernel: tpu_custom_call.1
= control target key start
LH: loop header
LB: loop body
LE: loop exit
PB: predicated region body
PF: predicated region fallthrough
CT: control target
= control target key end

     0   :  { %s1453_s0 = inlined_call_operand.hbm [shape: bf16[8,256], index: 0, kind: input, shape index: {}]   ;;  %s1454_s1 = inlined_call_operand.hbm [shape: bf16[256,128], index: 1, kind: input, shape index: {}]   ;;  %s1455_s2 = inlined_call_operand.vmem [shape: f32[1,128], index: 2, kind: input, shape index: {}]   ;;  %s1456_s3 = inlined_call_operand.hbm [shape: bf16[128,512], index: 3, kind: input, shape index: {}]   ;;  %s1457_s4 = inlined_call_operand.hbm [shape: f32[1,512], index: 4, kind: input, shape index: {}]   ;;  %s1458_s5 = inlined_call_operand.hbm [shape: f32[8,512], index: 5, kind: output, shape index: {}]  }
   0x1   :  { %1465 = sst [smem:[#allocation18_spill]] %s1453_s0 }
   0x2   :  { %1466 = sst [smem:[#allocation19_spill]] %s1456_s3 }
   0x3   :  { %10 = vsyncpa [#allocation3], 0 }
   0x4   :  { %11 = vsyncpa [#allocation6], 0 }
   0x5   :  { %12 = vsyncpa [#allocation4], 0 }
   0x6   :  { %14 = vsyncpa [#allocation4 + $0x1], 0  ;;  %s1230_s18 = smov 0   ;;  %s1232_s19 = smov 0  }
   0x7   :  { %s1234_s20 = smov 0   ;;  %s1236_s21 = smov 0  }
   0x8 LB: > { %1467 = sst [smem:[#allocation14_spill]] %s1179_s18  ;;  %s1251_s22 = sadd.s32 4294967295, %s1191_s21   ;;  %s1191_s21 = sphi %s1236_s21, %s1488_s21   ;;  %s1187_s20 = sphi %s1234_s20, %s1492_s20   ;;  %s1183_s19 = sphi %s1232_s19, %s1491_s19   ;;  %s1179_s18 = sphi %s1230_s18, %s1490_s18  }
   0x9   : > { %s736_s23 = sadd.s32 4294967294, %s1191_s21   ;;  %s1255_s24 = sadd.s32 1, %s1191_s21  }
   0xa   : > { %1468 = sst [smem:[#allocation15_spill]] %s1255_s24  ;;  %s90_s25 = sadd.s32 1, %s1187_s20 }
   0xb   : > { %s87_s26 = ssub.s32 %s1191_s21, %s1255_s24  ;;  %p97_p0 = scmp.ne.s32.totalorder %s1187_s20, %s1183_s19 }
   0xc   : > { %p88_p1 = scmp.eq.s32.totalorder %s87_s26, 0  ;;  %p98_p2 = scmp.eq.s32.totalorder %s1191_s21, 0 }
   0xd   : > { %p103_p3 = scmp.ne.s32.totalorder %s1183_s19, %s1179_s18  ;;  %p1460_p4 = scmp.eq.s32.totalorder %s1251_s22, 0 }
   0xe   : > { %s1267_s27 = scalar_select %p88_p1, %s1187_s20, %s90_s25  }
   0xf   : > { %p1269_p5 = por %p98_p2, %p97_p0  ;;  %p1275_p6 = por %p1460_p4, %p103_p3 }
  0x10   : > { %1469 = sst [smem:[#allocation16_spill]] %s1267_s27  ;;  %p153_p7 = scmp.eq.s32.totalorder %s1251_s22, 1 }
  0x11   : > { %p159_p8 = scmp.eq.s32.totalorder %s736_s23, 1  ;;  %p737_p9 = scmp.ge.s32.totalorder %s1191_s21, 1 }
  0x12   : > { %p166_p10 = scmp.lt.s32.totalorder %s1191_s21, 3  ;;  %p1282_p11 = por %p153_p7, %p97_p0 }
  0x13   : > { %p1286_p12 = por %p159_p8, %p103_p3  ;;  %s1476_s0 = sld [smem:[#allocation18_spill]] }
  0x14   : > { %p1290_p13 = pnand %p737_p9, %p166_p10  ;;  %s1193_s11 = smov [#allocation2]  }
  0x15   : > { %s1473_s6 = scalar_select %p1286_p12, 1, 0 }
  0x16   : > { %p933_p0 = pneg %p1290_p13  ;;  %s180_s12 = sshll.u32 %s1193_s11, 4  ;;  %s181_s12 = int_to_ptr.vmem [resolvable:$true] %s180_s12 }
  0x17   : > { %1474 = sst [smem:[#allocation17_spill]] %s1473_s6  ;;  %p953_p3 = scmp.lt.s32.totalorder %s1191_s21, 2 }
  0x18   : > { %p1302_p2 = pnand %p933_p0, %p1460_p4  ;;  %s208_s14 = sand.u32 1, %s1191_s21  }
  0x19   : > { %s178_s10 = sshll.u32 %s1476_s0, 4  ;;  %p1312_p7 = pnand %p953_p3, %p1269_p5  ;;  %s179_s10 = int_to_ptr.hbm [resolvable:$true] %s178_s10 }
  0x1a   : > { %936 = dma.hbm_to_vmem [thread:$0]  (!%p1302_p2), %s179_s10, 128, %s181_s12, [#allocation3]  }
  0x1b   : > { %s1459_s16 = sand.u32 1, %s1187_s20   ;;  %s885_s23 = sshll.u32 %s1191_s21, 3 }
  0x1c   : > { %s741_s17 = sshll.u32 %s1459_s16, 7  ;;  %s1479_s3 = sld [smem:[#allocation19_spill]] }
  0x1d   : > { %s212_s9 = scalar_lea.vmem [#allocation7], %s741_s17  ;;  %s1323_s28 = scalar_lea.sflag [#allocation3], %s208_s14 }
  0x1e   : > { %s220_s11 = sshll.u32 %s212_s9, 4  ;;  %p1031_p8 = pneg %p1312_p7  ;;  %s221_s11 = int_to_ptr.vmem [resolvable:$true] %s220_s11 }
  0x22   : > { %s217_s8 = scalar_lea.hbm %s1479_s3, %s885_s23  ;;  %s1034_s17 = scalar_lea.hbm %s1479_s3, 256 }
  0x23   : > { %s218_s0 = sshll.u32 %s217_s8, 4  ;;  %s219_s0 = int_to_ptr.hbm [resolvable:$true] %s218_s0 }
  0x24   : > { %s1027_s10 = sshra.s32 %s219_s0, 4  ;;  %s1028_s10 = int_to_ptr.hbm [resolvable:$true] %s1027_s10 }
  0x25   : > { %s1029_s12 = scalar_lea.hbm %s1028_s10, 128  ;;  %p1035_p0 = scmp.lt.s32.totalorder %s1028_s10, %s1479_s3 }
  0x26   : > { %p1030_p5 = scmp.ne.s32.totalorder %s1028_s10, %s1029_s12  ;;  %p1036_p3 = scmp.lt.s32.totalorder %s1034_s17, %s1029_s12 }
  0x28   : > { %p1032_p9 = pnand %p1031_p8, %p1030_p5  ;;  %p1037_p1 = por %p1036_p3, %p1035_p0 }
  0x2a   : > { %p1033_p10 = pneg %p1032_p9 }
  0x2c   : > { %p1038_p4 = pnand %p1037_p1, %p1033_p10 }
  0x2e   : > { %1041 = shalt.err (!%p1038_p4)
}
  0x2f   : > { %s1194_s14 = smov 256   ;;  %s1195_s8 = smov 128  }
  0x30   : > { %s1196_s9 = smov 8   ;;  %s189_s27 = sshll.u32 %s1454_s1, 4  ;;  %s190_s27 = int_to_ptr.hbm [resolvable:$true] %s189_s27 }
  0x31   : > { %943 = dma.hbm_to_vmem [thread:$0]  (!%p1312_p7), %s219_s0, 2048, %s221_s11, %s1323_s28, %s1194_s14, %s1195_s8, %s1196_s9  }
  0x32   : > { %s1197_s10 = smov [#allocation5]   ;;  %s1480_s17 = sand.u32 1, %s1187_s20  }
  0x33   : > { %s191_s12 = sshll.u32 %s1197_s10, 4  ;;  %s744_s23 = sshll.u32 %s1480_s17, 1  ;;  %s192_s12 = int_to_ptr.vmem [resolvable:$true] %s191_s12 }
  0x34   : > { %s1198_s26 = smov 64   ;;  %s1199_s3 = smov 4  }
  0x35   : > { %939 = dma.hbm_to_vmem [thread:$0]  (!%p1302_p2), %s190_s27, 2048, %s192_s12, [#allocation6], %s1198_s26, %s1198_s26, %s1199_s3  }
  0x36   : > { %s745_s24 = sshll.u32 %s1191_s21, 1  ;;  %s234_s11 = scalar_lea.vmem [#allocation8], %s744_s23 }
  0x37   : > { %s238_s0 = scalar_lea.hbm %s1457_s4, %s745_s24  ;;  %s242_s14 = sshll.u32 %s234_s11, 4  ;;  %s243_s14 = int_to_ptr.vmem [resolvable:$true] %s242_s14 }
  0x38   : > { %s240_s8 = sshll.u32 %s238_s0, 4  ;;  %s1094_s27 = scalar_lea.hbm %s1457_s4, 4  ;;  %s241_s8 = int_to_ptr.hbm [resolvable:$true] %s240_s8 }
  0x39   : > { %s1087_s9 = sshra.s32 %s241_s8, 4  ;;  %s1088_s9 = int_to_ptr.hbm [resolvable:$true] %s1087_s9 }
  0x3a   : > { %s1089_s16 = scalar_lea.hbm %s1088_s9, 2  ;;  %p1095_p2 = scmp.lt.s32.totalorder %s1088_s9, %s1457_s4 }
  0x3b   : > { %p1090_p4 = scmp.ne.s32.totalorder %s1088_s9, %s1089_s16  ;;  %p1096_p9 = scmp.lt.s32.totalorder %s1094_s27, %s1089_s16 }
  0x3d   : > { %p1092_p1 = pnand %p1090_p4, %p1031_p8  ;;  %p1097_p10 = por %p1096_p9, %p1095_p2 }
  0x3f   : > { %p1093_p5 = pneg %p1092_p1 }
  0x41   : > { %p1098_p0 = pnand %p1097_p10, %p1093_p5 }
  0x43   : > { %1101 = shalt.err (!%p1098_p0)
}
  0x44   : > { %946 = dma.hbm_to_vmem [thread:$0]  (!%p1312_p7), %s241_s8, 32, %s243_s14, %s1323_s28  }
  0x45   : > { %251 = sbr.rel (%p1290_p13) target bundleno = 387 (0x183), region = 40  ;;  %p1481_p8 = scmp.eq.s32.totalorder (!%p1290_p13), %s1251_s22, 0 }
  0x4a   : > { %1162 = dma.done.wait (%p1481_p8), [#allocation3], 128   ;;  %p1482_p3 = pmov %p1481_p8 }
  0x4c   : > { %1164 = vsyncadd (%p1482_p3), [#allocation3], 4294967168  ;;  %p1483_p4 = pmov %p1482_p3 }
  0x4d   : > { %p1484_p1 = pmov %p1482_p3 }
  0x4e   : > { %1166 = dma.done.wait (%p1483_p4), [#allocation6], 2048  }
  0x4f   : > { %1168 = vsyncadd (%p1484_p1), [#allocation6], 4294965248  ;;  %s263_s24 = sand.u32 1, %s1251_s22   ;;  %s1374_s6 = sand.u32 1, %s1183_s19  }
  0x50   : > { %s749_s7 = sshll.u32 %s1374_s6, 7  ;;  %s264_s15 = scalar_lea.sflag [#allocation3], %s263_s24 }
  0x51   : > { %s1377_s28 = scalar_lea.vmem [#allocation7], %s749_s7 }
  0x52   : > { %1170 = dma.done.wait (%p1275_p6), %s264_s15, 2080  }
  0x53   : > { %1172 = vsyncadd (%p1275_p6), %s264_s15, 4294965216  ;;  %v893_v0 = vld [vmem:[#allocation5 + $0x38] sm:$0xff]  ;;  %v892_v2 = vld [vmem:[#allocation5 + $0x30] sm:$0xff]  ;;  %s750_s12 = sshll.u32 %s1374_s6, 1  ;;  %s918_s17 = sshll.u32 %s1251_s22, 4 }
  0x54   : > { %v901_v1 = vld [vmem:[#allocation5 + $0x78] sm:$0xff]  ;;  %453 = vmatpush.bf16.msra.mxu0 %v893_v0  ;;  %v900_v3 = vld [vmem:[#allocation5 + $0x70] sm:$0xff]  ;;  %v891_v4 = vld [vmem:[#allocation5 + $0x28] sm:$0xff]  ;;  %s277_s23 = scalar_lea.vmem [#allocation8], %s750_s12  ;;  %s751_s26 = sshll.u32 %s1374_s6, 4 }
  0x55   : > { %466 = vmatpush.bf16.msra.mxu1 %v901_v1  ;;  %v899_v5 = vld [vmem:[#allocation5 + $0x68] sm:$0xff]  ;;  %v874_v6 = vld [vmem:[%s1377_s28 + $0x70] sm:$0xf]  ;;  %v917_v7 = vld [vmem:[%s1377_s28 + $0x74] sm:$0xf0]  ;;  %s622_s14 = scalar_lea.hbm %s1458_s5, %s918_s17  ;;  %s309_s8 = scalar_lea.vmem [#allocation9], %s751_s26 }
  0x56   : > { %v916_v8 = vld [vmem:[%s1377_s28 + $0x74] sm:$0xf]  ;;  %v876_v9 = vld [vmem:[%s1377_s28 + $0x78] sm:$0xf0]  ;;  %v875_v10 = vor.u32 %v917_v7, %v874_v6  ;;  %v866_v12 = vld [vmem:[%s1377_s28 + $0x60] sm:$0xf] }
  0x57   : > { %v879_v11 = vor.u32 %v916_v8, %v876_v9  ;;  %v915_v13 = vld [vmem:[%s1377_s28 + $0x64] sm:$0xf0]  ;;  %v914_v14 = vld [vmem:[%s1377_s28 + $0x64] sm:$0xf]  ;;  %v868_v15 = vld [vmem:[%s1377_s28 + $0x68] sm:$0xf0] }
  0x58   : > { %454 = vmatpush.bf16.msra.mxu0 %v892_v2  ;;  %v890_v16 = vld [vmem:[#allocation5 + $0x20] sm:$0xff]  ;;  %582 = vmatpush.bf16.msra.mxu2 %v875_v10  ;;  %v867_v18 = vor.u32 %v915_v13, %v866_v12  ;;  %v871_v19 = vor.u32 %v914_v14, %v868_v15  ;;  %v858_v20 = vld [vmem:[%s1377_s28 + $0x50] sm:$0xf]  ;;  %v913_v21 = vld [vmem:[%s1377_s28 + $0x54] sm:$0xf0]  ;;  %s624_s9 = sshll.u32 %s309_s8, 4  ;;  %s625_s9 = int_to_ptr.vmem [resolvable:$true] %s624_s9 }
  0x59   : > { %467 = vmatpush.bf16.msra.mxu1 %v900_v3  ;;  %v898_v17 = vld [vmem:[#allocation5 + $0x60] sm:$0xff]  ;;  %595 = vmatpush.bf16.msra.mxu3 %v879_v11  ;;  %v912_v22 = vld [vmem:[%s1377_s28 + $0x54] sm:$0xf]  ;;  %v860_v23 = vld [vmem:[%s1377_s28 + $0x58] sm:$0xf0]  ;;  %v859_v26 = vor.u32 %v913_v21, %v858_v20  ;;  %s626_s16 = sshll.u32 %s622_s14, 4  ;;  %s627_s16 = int_to_ptr.hbm [resolvable:$true] %s626_s16 }
  0x5a   : > { %v889_v24 = vld [vmem:[#allocation5 + $0x18] sm:$0xff]  ;;  %v863_v27 = vor.u32 %v912_v22, %v860_v23  ;;  %v850_v28 = vld [vmem:[%s1377_s28 + $0x40] sm:$0xf]  ;;  %v911_v29 = vld [vmem:[%s1377_s28 + $0x44] sm:$0xf0]  ;;  %s611_s22 = scalar_lea.sflag [#allocation4], %s1374_s6 }
  0x5b   : > { %v897_v25 = vld [vmem:[#allocation5 + $0x58] sm:$0xff]  ;;  %v910_v30 = vld [vmem:[%s1377_s28 + $0x44] sm:$0xf]  ;;  %v852_v31 = vld [vmem:[%s1377_s28 + $0x48] sm:$0xf0]  ;;  %v851_v34 = vor.u32 %v911_v29, %v850_v28  ;;  %s1131_s13 = sshra.s32 %s627_s16, 4  ;;  %s1132_s13 = int_to_ptr.hbm [resolvable:$true] %s1131_s13 }
  0x5c   : > { %455 = vmatpush.bf16.msra.mxu0 %v891_v4  ;;  %583 = vmatpush.bf16.msra.mxu2 %v867_v18  ;;  %v888_v32 = vld [vmem:[#allocation5 + $0x10] sm:$0xff]  ;;  %v855_v35 = vor.u32 %v910_v30, %v852_v31  ;;  %v909_v37 = vld [vmem:[%s1377_s28 + $0x34] sm:$0xf0]  ;;  %v844_v39 = vld [vmem:[%s1377_s28 + $0x38] sm:$0xf0]  ;;  %s1133_s3 = scalar_lea.hbm %s1132_s13, 16  ;;  %p1138_p5 = scmp.lt.s32.totalorder %s1132_s13, %s1458_s5 }
  0x5d   : > { %468 = vmatpush.bf16.msra.mxu1 %v899_v5  ;;  %596 = vmatpush.bf16.msra.mxu3 %v871_v19  ;;  %v896_v33 = vld [vmem:[#allocation5 + $0x50] sm:$0xff]  ;;  %v887_v40 = vld [vmem:[#allocation5 + $0x8] sm:$0xff]  ;;  %v313_v42 = vld [vmem:[#allocation2] sm:$0xff]  ;;  %p1134_p6 = scmp.ne.s32.totalorder %s1132_s13, %s1133_s3  ;;  %s1137_s18 = scalar_lea.hbm %s1458_s5, 32 }
  0x5e   : > { %v842_v36 = vld [vmem:[%s1377_s28 + $0x30] sm:$0xf]  ;;  %v908_v38 = vld [vmem:[%s1377_s28 + $0x34] sm:$0xf]  ;;  %v895_v41 = vld [vmem:[#allocation5 + $0x48] sm:$0xff]  ;;  %v351_v49 = vunpack.c.l.b16 %v313_v42  ;;  %v352_v50 = vunpack.c.h.b16 %v313_v42  ;;  %p1139_p2 = scmp.lt.s32.totalorder %s1137_s18, %s1133_s3 }
  0x5f   : > { %v843_v43 = vor.u32 %v909_v37, %v842_v36  ;;  %v847_v44 = vor.u32 %v908_v38, %v844_v39  ;;  %v834_v45 = vld [vmem:[%s1377_s28 + $0x20] sm:$0xf]  ;;  %v907_v46 = vld [vmem:[%s1377_s28 + $0x24] sm:$0xf0]  ;;  %v906_v47 = vld [vmem:[%s1377_s28 + $0x24] sm:$0xf]  ;;  %p1135_p13 = pnand %p1134_p6, %p1282_p11 }
  0x60   : > { %456 = vmatpush.bf16.msra.mxu0 %v890_v16  ;;  %584 = vmatpush.bf16.msra.mxu2 %v859_v26  ;;  %v836_v48 = vld [vmem:[%s1377_s28 + $0x28] sm:$0xf0]  ;;  %v835_v51 = vor.u32 %v907_v46, %v834_v45  ;;  %v886_v53 = vld [vmem:[#allocation5] sm:$0xff]  ;;  %v353_v55 = vpack.c.b16 %v351_v49, %v351_v49  ;;  %v354_v56 = vpack.c.b16 %v352_v50, %v352_v50  ;;  %v826_v57 = vld [vmem:[%s1377_s28 + $0x10] sm:$0xf]  ;;  %p1140_p9 = por %p1139_p2, %p1138_p5 }
  0x61   : > { %469 = vmatpush.bf16.msra.mxu1 %v898_v17  ;;  %597 = vmatpush.bf16.msra.mxu3 %v863_v27  ;;  %v839_v52 = vor.u32 %v906_v47, %v836_v48  ;;  %v894_v54 = vld [vmem:[#allocation5 + $0x40] sm:$0xff]  ;;  %v905_v58 = vld [vmem:[%s1377_s28 + $0x14] sm:$0xf0]  ;;  %v904_v59 = vld [vmem:[%s1377_s28 + $0x14] sm:$0xf]  ;;  %p1136_p7 = pneg %p1135_p13 }
  0x62   : > { %v827_v60 = vor.u32 %v905_v58, %v826_v57  ;;  %v828_v61 = vld [vmem:[%s1377_s28 + $0x18] sm:$0xf0]  ;;  %v818_v63 = vld [vmem:[%s1377_s28] sm:$0xf]  ;;  %v903_v0 = vld [vmem:[%s1377_s28 + $0x4] sm:$0xf0] }
  0x63   : > { %v831_v62 = vor.u32 %v904_v59, %v828_v61  ;;  %v902_v1 = vld [vmem:[%s1377_s28 + $0x4] sm:$0xf]  ;;  %v819_v2 = vor.u32 %v903_v0, %v818_v63  ;;  %v820_v3 = vld [vmem:[%s1377_s28 + $0x8] sm:$0xf0]  ;;  %v996_v5 = vld [vmem:[%s1455_s2] ss:$0 sm:$0xff]  ;;  %p1141_p10 = pnand %p1140_p9, %p1136_p7 }
  0x64   : > { %457 = vmatpush.bf16.msra.mxu0 %v889_v24  ;;  %585 = vmatpush.bf16.msra.mxu2 %v851_v34  ;;  %v823_v4 = vor.u32 %v902_v1, %v820_v3  ;;  %v496_v13 = vld [vmem:[%s277_s23] sm:$0x3] }
  0x65   : > { %470 = vmatpush.bf16.msra.mxu1 %v897_v25  ;;  %598 = vmatpush.bf16.msra.mxu3 %v855_v35  ;;  %v498_v14 = vperm.slane %v496_v13, 0  ;;  %v499_v15 = vperm.slane %v496_v13, 1 }
  0x68   : > { %458 = vmatpush.bf16.msra.mxu0 %v888_v32  ;;  %586 = vmatpush.bf16.msra.mxu2 %v843_v43 }
  0x69   : > { %471 = vmatpush.bf16.msra.mxu1 %v896_v33  ;;  %599 = vmatpush.bf16.msra.mxu3 %v847_v44 }
  0x6c   : > { %459 = vmatpush.bf16.msra.mxu0 %v887_v40  ;;  %587 = vmatpush.bf16.msra.mxu2 %v835_v51 }
  0x6d   : > { %472 = vmatpush.bf16.msra.mxu1 %v895_v41  ;;  %600 = vmatpush.bf16.msra.mxu3 %v839_v52 }
  0x70   : > { %460 = vmatpush.bf16.msra.mxu0 %v886_v53  ;;  %588 = vmatpush.bf16.msra.mxu2 %v827_v60 }
  0x71   : > { %473 = vmatpush.bf16.msra.mxu1 %v894_v54  ;;  %601 = vmatpush.bf16.msra.mxu3 %v831_v62 }
  0x73   : > { %461 = vmatmul.bf16.vlgmr.msra.gmra.mxu0 %v353_v55 }
  0x74   : > { %474 = vmatmul.bf16.vlgmr.msra.gmra.mxu1 %v354_v56  ;;  %589 = vmatpush.bf16.msra.mxu2 %v819_v2 }
  0x75   : > { %602 = vmatpush.bf16.msra.mxu3 %v823_v4 }
  0xf0   : > { %v462_v6 = vpop.f32.mrf.mxu0 }
  0xf1   : > { %v475_v7 = vpop.f32.mrf.mxu1  ;;  %v463_v8 = vadd.f32 %v996_v5, %v462_v6 }
  0xf3   : > { %v476_v9 = vadd.f32 %v475_v7, %v463_v8 }
  0xf5   : > { %v479_v10 = vpack.c.bf16 %v476_v9, %v476_v9 }
  0xf7   : > { %590 = vmatmul.bf16.vlgmr.msra.gmra.mxu2 %v479_v10  ;;  %603 = vmatmul.bf16.vlgmr.msra.gmra.mxu3 %v479_v10 }
  0xf8   : > { %v464_v11 = vpop.f32.mrf.mxu0 }
  0xf9   : > { %v477_v12 = vpop.f32.mrf.mxu1 }
 0x17a   : > { %v591_v16 = vpop.f32.mrf.mxu2  ;;  %v604_v17 = vpop.f32.mrf.mxu3 }
 0x17b   : > { %v592_v18 = vadd.f32 %v591_v16, %v498_v14  ;;  %v605_v19 = vadd.f32 %v604_v17, %v499_v15 }
 0x17d   : > { %608 = vst [vmem:[%s309_s8] sm:$0xff] %v592_v18 }
 0x17e   : > { %609 = vst [vmem:[%s309_s8 + $0x8] sm:$0xff] %v605_v19 }
 0x17f   : > { %1144 = shalt.err (!%p1141_p10)
}
 0x180   : > { %931 = dma.vmem_to_hbm [thread:$0]  (%p1282_p11), %s625_s9, 256, %s627_s16, %s611_s22  }
 0x182   : > { %v593_v20 = vpop.f32.mrf.mxu2  ;;  %v606_v21 = vpop.f32.mrf.mxu3 }
 0x183 PF: > { %s1485_s6 = sld [smem:[#allocation14_spill]]  ;;  %p1487_p0 = scmp.ge.s32.totalorder %s1191_s21, 2 }
 0x185   : > { %p948_p8 = pnand %p1487_p0, %p1286_p12 }
 0x187   : > { %p949_p3 = pneg %p948_p8 }
 0x189   : > { %s638_s28 = sand.u32 1, %s1485_s6  }
 0x18a   : > { %s639_s29 = scalar_lea.sflag [#allocation4], %s638_s28 }
 0x18b   : > { %1174 = dma.done.wait (%p949_p3), %s639_s29, 256  }
 0x18c   : > { %1176 = vsyncadd (%p949_p3), %s639_s29, 4294967040  ;;  %s1488_s21 = sld [smem:[#allocation15_spill]]  ;;  %s1490_s18 = smov %s1183_s19 }
 0x18d   : > { %s1489_s10 = sld [smem:[#allocation16_spill]]  ;;  %s1491_s19 = smov %s1187_s20 }
 0x192   : > { %p17_p11 = scmp.ge.s32.totalorder %s1488_s21, 4  }
 0x193   : > { %s1492_s20 = smov %s1489_s10 }
 0x194   :  { %19 = sbr.rel (!%p17_p11) target bundleno = 8 (0x8), region = 103 }
 0x199   :  { %645 = vsyncpa [#allocation3], 1 }
 0x19a   :  { %647 = vsyncpa [#allocation3 + $0x1], 1 }
 0x19b   :  { %648 = vsyncpa [#allocation6], 1 }
 0x19c   :  { %649 = vsyncpa [#allocation4], 1 }
 0x19d   :  { %651 = vsyncpa [#allocation4 + $0x1], 1 }

</bundles_post_ra>
